<compile_context>
chip_gen: v5e
topology: v5e:2x2
jax: 0.10.0
libtpu: 0.0.40
codegen_flags: <defaults>
</compile_context>

<pallas_src>
import functools

import jax
import jax.numpy as jnp
from jax import lax
from jax.experimental import pallas as pl
from jax.experimental.pallas import tpu as pltpu

_INV_SQRT2 = 0.7071067811865476


def _round_up(x, m):
    return ((x + m - 1) // m) * m


def _intermediate_kernel(x_ref, w_ref, b_ref, o_ref):
    # x_ref: (tm, H)   w_ref: (H, tn)   b_ref: (1, tn)   o_ref: (tm, tn)
    # Matmul on the MXU with f32 accumulation; bias + exact erf-GELU epilogue
    # runs on VPU/EUP and is hidden under the matmul at large tiles.
    y = jnp.dot(x_ref[...], w_ref[...], preferred_element_type=jnp.float32)
    y = y + b_ref[...].astype(jnp.float32)
    g = 0.5 * y * (1.0 + lax.erf(y * _INV_SQRT2))
    o_ref[...] = g.astype(o_ref.dtype)


def deberta_v2_intermediate(hidden_states, weight, bias, *,
                            tm=512, tn=1024, compute_dtype=None):
    """DebertaV2Intermediate forward.

    hidden_states: [B, S, H]
    weight:        [H, I]  (math layout, i.e. transpose of nn.Linear.weight)
    bias:          [I]
    compute_dtype: optional MXU input dtype (e.g. jnp.bfloat16); accumulation
                   stays f32 and the output keeps hidden_states.dtype.
    """
    B, S, H = hidden_states.shape
    Hw, I = weight.shape
    assert Hw == H, "weight must be [hidden_size, intermediate_size]"
    M = B * S
    out_dtype = hidden_states.dtype

    if compute_dtype is not None:
        hidden_states = hidden_states.astype(compute_dtype)
        weight = weight.astype(compute_dtype)

    x2d = hidden_states.reshape(M, H)
    w2d = weight
    b2d = bias.reshape(1, I)

    # ---- tile sizes (sublane/lane aligned, clamped to problem size) ----
    tm_eff = min(tm, _round_up(M, 8))           # multiple of 8
    if I <= tn:
        tn_eff = I                              # full-dim block (any width OK)
    else:
        tn_eff = max(128, (tn // 128) * 128)    # lane-dense multiple of 128

    Mp = _round_up(M, tm_eff)
    Ip = _round_up(I, tn_eff)
    if Mp != M:
        x2d = jnp.pad(x2d, ((0, Mp - M), (0, 0)))
    if Ip != I:
        w2d = jnp.pad(w2d, ((0, 0), (0, Ip - I)))
        b2d = jnp.pad(b2d, ((0, 0), (0, Ip - I)))

    ni = Mp // tm_eff
    nj = Ip // tn_eff

    # ---- grid ordering: minimize re-streamed HBM bytes ----
    # (i outer, j inner): activations fetched once, weight re-read ni times.
    # (j outer, i inner): weight fetched once, activations re-read nj times.
    itemsize = jnp.dtype(x2d.dtype).itemsize
    weight_restream = H * Ip * itemsize * ni
    act_restream = Mp * H * itemsize * nj
    if weight_restream <= act_restream:
        grid = (ni, nj)
        x_map = lambda i, j: (i, 0)
        w_map = lambda i, j: (0, j)
        b_map = lambda i, j: (0, j)
        o_map = lambda i, j: (i, j)
    else:
        grid = (nj, ni)
        x_map = lambda j, i: (i, 0)
        w_map = lambda j, i: (0, j)
        b_map = lambda j, i: (0, j)
        o_map = lambda j, i: (i, j)

    out2d = pl.pallas_call(
        _intermediate_kernel,
        out_shape=jax.ShapeDtypeStruct((Mp, Ip), out_dtype),
        grid_spec=pltpu.PrefetchScalarGridSpec(
            num_scalar_prefetch=0,
            grid=grid,
            in_specs=[
                pl.BlockSpec((tm_eff, H), x_map),     # activation tile
                pl.BlockSpec((H, tn_eff), w_map),     # weight column-tile
                pl.BlockSpec((1, tn_eff), b_map),     # bias tile
            ],
            out_specs=pl.BlockSpec((tm_eff, tn_eff), o_map),
        ),
        compiler_params=pltpu.CompilerParams(
            dimension_semantics=("parallel", "parallel"),
            vmem_limit_bytes=48 * 1024 * 1024,
        ),
    )(x2d, w2d, b2d)

    if Mp != M or Ip != I:
        out2d = out2d[:M, :I]
    return out2d.reshape(B, S, I)


def _reference(hidden_states, weight, bias):
    y = jnp.einsum("bsh,hi->bsi", hidden_states, weight) + bias
    return jax.nn.gelu(y, approximate=False)


if __name__ == "__main__":
    # Small config consistent with the module: hidden_size=32, intermediate_size=64
    batch, seq, hidden_size, intermediate_size = 2, 8, 32, 64

    key = jax.random.PRNGKey(0)
    k_x, k_w, k_b = jax.random.split(key, 3)

    hidden_states = jax.random.normal(
        k_x, (batch, seq, hidden_size), dtype=jnp.float32)
    weight = jax.random.normal(
        k_w, (hidden_size, intermediate_size), dtype=jnp.float32) * 0.02
    bias = jax.random.normal(
        k_b, (intermediate_size,), dtype=jnp.float32) * 0.02

    ref = _reference(hidden_states, weight, bias)

    # f32 path (tight tolerance)
    out = deberta_v2_intermediate(hidden_states, weight, bias)
    out = jax.block_until_ready(out)
    assert out.shape == (batch, seq, intermediate_size)
    assert jnp.allclose(out, ref, atol=1e-5, rtol=1e-5), "f32 mismatch vs reference"

    # bf16 MXU-input path (f32 accumulation), looser tolerance
    out_bf16 = deberta_v2_intermediate(
        hidden_states, weight, bias, compute_dtype=jnp.bfloat16)
    out_bf16 = jax.block_until_ready(out_bf16)
    assert jnp.allclose(out_bf16, ref, atol=2e-2, rtol=2e-2), "bf16 mismatch vs reference"

    print("KERNEL_OK")
</pallas_src>

<mosaic_0001>
module attributes {stable_mosaic.version = 11 : i64} {
  func.func @_intermediate_kernel(%arg0: i32, %arg1: i32, %arg2: memref<16x32xf32, #tpu.memory_space<vmem>>, %arg3: memref<32x64xf32, #tpu.memory_space<vmem>>, %arg4: memref<1x64xf32, #tpu.memory_space<vmem>>, %arg5: memref<16x64xf32, #tpu.memory_space<vmem>>) attributes {dimension_semantics = [#tpu.dimension_semantics<parallel>, #tpu.dimension_semantics<parallel>], iteration_bounds = array<i64: 1, 1>, scalar_prefetch = 0 : i64, scratch_operands = 0 : i64, tpu.core_type = #tpu.core_type<tc>, window_params = [{transform_indices = @transform_0, window_bounds = array<i64: 16, 32>}, {transform_indices = @transform_1, window_bounds = array<i64: 32, 64>}, {transform_indices = @transform_2, window_bounds = array<i64: 1, 64>}, {transform_indices = @transform_3, window_bounds = array<i64: 16, 64>}]} {
    %c0 = arith.constant 0 : index
    %c0_0 = arith.constant 0 : index
    %0 = vector.load %arg2[%c0, %c0_0] : memref<16x32xf32, #tpu.memory_space<vmem>>, vector<16x32xf32>
    %c0_1 = arith.constant 0 : index
    %c0_2 = arith.constant 0 : index
    %1 = vector.load %arg3[%c0_1, %c0_2] : memref<32x64xf32, #tpu.memory_space<vmem>>, vector<32x64xf32>
    %cst = arith.constant dense<0.000000e+00> : vector<16x64xf32>
    %2 = tpu.matmul %0, %1, %cst {dimension_numbers = #tpu.dot_dimension_numbers<[1], [0], [0], [1], [0, 0, 1, 1], [], []>} : vector<16x32xf32>, vector<32x64xf32>, vector<16x64xf32> -> vector<16x64xf32>
    %c0_3 = arith.constant 0 : index
    %c0_4 = arith.constant 0 : index
    %3 = vector.load %arg4[%c0_3, %c0_4] : memref<1x64xf32, #tpu.memory_space<vmem>>, vector<1x64xf32>
    %4 = vector.broadcast %3 : vector<1x64xf32> to vector<16x64xf32>
    %5 = arith.addf %2, %4 : vector<16x64xf32>
    %cst_5 = arith.constant 5.000000e-01 : f32
    %6 = vector.broadcast %cst_5 : f32 to vector<16x64xf32>
    %7 = arith.mulf %6, %5 : vector<16x64xf32>
    %cst_6 = arith.constant 0.707106769 : f32
    %8 = vector.broadcast %cst_6 : f32 to vector<16x64xf32>
    %9 = arith.mulf %5, %8 : vector<16x64xf32>
    %10 = math.erf %9 : vector<16x64xf32>
    %cst_7 = arith.constant 1.000000e+00 : f32
    %11 = vector.broadcast %cst_7 : f32 to vector<16x64xf32>
    %12 = arith.addf %11, %10 : vector<16x64xf32>
    %13 = arith.mulf %7, %12 : vector<16x64xf32>
    %c0_8 = arith.constant 0 : index
    %c0_9 = arith.constant 0 : index
    %14 = vector.load %arg5[%c0_8, %c0_9] : memref<16x64xf32, #tpu.memory_space<vmem>>, vector<16x64xf32>
    tpu.vector_store %arg5[%c0_8, %c0_9], %13 {strides = array<i32>} : memref<16x64xf32, #tpu.memory_space<vmem>>, vector<16x64xf32>,
    return
  }
  func.func @transform_0(%arg0: i32, %arg1: i32) -> (i32, i32) {
    %c0_i32 = arith.constant 0 : i32
    %c0_i32_0 = arith.constant 0 : i32
    return %arg1, %c0_i32 : i32, i32
  }
  func.func @transform_1(%arg0: i32, %arg1: i32) -> (i32, i32) {
    %c0_i32 = arith.constant 0 : i32
    %c0_i32_0 = arith.constant 0 : i32
    return %c0_i32, %arg0 : i32, i32
  }
  func.func @transform_2(%arg0: i32, %arg1: i32) -> (i32, i32) {
    %c0_i32 = arith.constant 0 : i32
    %c0_i32_0 = arith.constant 0 : i32
    return %c0_i32, %arg0 : i32, i32
  }
  func.func @transform_3(%arg0: i32, %arg1: i32) -> (i32, i32) {
    %c0_i32 = arith.constant 0 : i32
    return %arg1, %arg0 : i32, i32
  }
}

</mosaic_0001>

<bundles_post_ra>
// kernel: tpu_custom_call.1
= control target key start
LH: loop header
LB: loop body
LE: loop exit
PB: predicated region body
PF: predicated region fallthrough
CT: control target
= control target key end

     0   :  { %8 = vsyncpa [#allocation3], 0  ;;  %s358_s0 = inlined_call_operand.hbm [shape: f32[16,32], index: 0, kind: input, shape index: {}]   ;;  %s359_s1 = inlined_call_operand.hbm [shape: f32[32,64], index: 1, kind: input, shape index: {}]   ;;  %s360_s2 = inlined_call_operand.vmem [shape: f32[1,64], index: 2, kind: input, shape index: {}]   ;;  %s361_s3 = inlined_call_operand.hbm [shape: f32[16,64], index: 3, kind: output, shape index: {}]  }
   0x1   :  { %9 = vsyncpa [#allocation6], 0 }
   0x2   :  { %10 = vsyncpa [#allocation4], 0  ;;  %s15_s14 = sshll.u32 %s358_s0, 4  ;;  %s294_s15 = smov [#allocation2]   ;;  %s16_s14 = int_to_ptr.hbm [resolvable:$true] %s15_s14 }
   0x3   :  { %s17_s16 = sshll.u32 %s294_s15, 4  ;;  %s28_s19 = sshll.u32 %s359_s1, 4  ;;  %s18_s16 = int_to_ptr.vmem [resolvable:$true] %s17_s16  ;;  %s29_s19 = int_to_ptr.hbm [resolvable:$true] %s28_s19 }
   0x4   :  { %s295_s20 = smov 128   ;;  %s296_s21 = smov 8  }
   0x5   :  { %23 = dma.hbm_to_vmem [thread:$0]  %s16_s14, 256, %s18_s16, [#allocation3], %s295_s20, %s295_s20, %s296_s21  }
   0x6   :  { %s297_s22 = smov [#allocation5]  }
   0x7   :  { %s30_s23 = sshll.u32 %s297_s22, 4  ;;  %s31_s23 = int_to_ptr.vmem [resolvable:$true] %s30_s23 }
   0x8   :  { %36 = dma.hbm_to_vmem [thread:$0]  %s29_s19, 512, %s31_s23, [#allocation6], %s295_s20, %s295_s20, %s296_s21  }
   0x9   :  { %288 = dma.done.wait [#allocation3], 256  }
   0xa   :  { %289 = vsyncadd [#allocation3], 4294967040 }
   0xb   :  { %290 = dma.done.wait [#allocation6], 512  }
   0xc   :  { %291 = vsyncadd [#allocation6], 4294966784  ;;  %v52_v0 = vld [vmem:[#allocation5 + $0x18] sm:$0xff]  ;;  %v51_v1 = vld [vmem:[#allocation5 + $0x10] sm:$0xff]  ;;  %vm57_vm0 = vcmask 261120   ;;  %s184_s27 = sshll.u32 %s361_s3, 4  ;;  %s185_s27 = int_to_ptr.hbm [resolvable:$true] %s184_s27 }
   0xd   :  { %76 = vmatpush.msra.mxu0 %v52_v0  ;;  %202 = vmatpush.msra.mxu1 %v52_v0  ;;  %v50_v2 = vld [vmem:[#allocation5 + $0x8] sm:$0xff]  ;;  %v49_v3 = vld [vmem:[#allocation5] sm:$0xff]  ;;  %v47_v4 = vld [vmem:[#allocation2] sm:$0xff]  ;;  %vm175_vm9 = vcmask 523264  }
   0xe   :  { %v48_v5 = vld [vmem:[#allocation2 + $0x8] sm:$0xff]  ;;  %v211_v6 = vld [vmem:[%s360_s2] ss:$0 sm:$0xff]  ;;  %s298_s2 = smov [#allocation7]  }
   0xf   :  { %77 = vmatpush.msra.mxu0 %v51_v1  ;;  %203 = vmatpush.msra.mxu1 %v51_v1  ;;  %s182_s24 = sshll.u32 %s298_s2, 4  ;;  %s183_s24 = int_to_ptr.vmem [resolvable:$true] %s182_s24 }
  0x11   :  { %78 = vmatpush.msra.mxu0 %v50_v2  ;;  %204 = vmatpush.msra.mxu1 %v50_v2 }
  0x13   :  { %79 = vmatpush.msra.mxu0 %v49_v3  ;;  %205 = vmatpush.msra.mxu1 %v49_v3 }
  0x14   :  { %198 = vmatmul.msk.f32.vlgmr.msra.gmra.mxu0 %vm57_vm0, %v47_v4  ;;  %199 = vmatmul.msk.f32.vlgmr.msra.gmra.mxu1 %vm57_vm0, %v48_v5 }
  0x91   :  { %v81_v7 = vpop.f32.mrf.mxu0  ;;  %v84_v8 = vpop.f32.mrf.mxu1 }
  0x92   :  { %v334_v9 = vadd.f32 %v211_v6, %v81_v7  ;;  %v336_v10 = vadd.f32 %v211_v6, %v84_v8 }
  0x94   :  { %v339_v11 = vmul.f32 0.70710677, %v334_v9  ;;  %v342_v12 = vmul.f32 0.70710677, %v336_v10 }
  0x96   :  { %v91_v13 = vmul.f32 %v339_v11, %v339_v11  ;;  %v131_v14 = vmul.f32 %v342_v12, %v342_v12 }
  0x98   :  { %v92_v15 = vmin.f32 %v91_v13, 16.0  ;;  %v132_v16 = vmin.f32 %v131_v14, 16.0 }
  0x9a   :  { %v93_v17 = vmul.f32 2.1237322e-06, %v92_v15  ;;  %v104_v18 = vmul.f32 3.8918573e-05, %v92_v15  ;;  %v133_v19 = vmul.f32 2.1237322e-06, %v132_v16 }
  0x9b   :  { %v144_v20 = vmul.f32 3.8918573e-05, %v132_v16 }
  0x9c   :  { %v94_v21 = vadd.f32 0.00028619796, %v93_v17  ;;  %v105_v22 = vadd.f32 0.001143296, %v104_v18  ;;  %v134_v23 = vadd.f32 0.00028619796, %v133_v19 }
  0x9d   :  { %v145_v24 = vadd.f32 0.001143296, %v144_v20 }
  0x9e   :  { %v95_v25 = vmul.f32 %v94_v21, %v92_v15  ;;  %v106_v26 = vmul.f32 %v105_v22, %v92_v15  ;;  %v135_v27 = vmul.f32 %v134_v23, %v132_v16  ;;  %v87_v23 = vmul.f32 0.5, %v334_v9 }
  0x9f   :  { %v146_v28 = vmul.f32 %v145_v24, %v132_v16 }
  0xa0   :  { %v96_v29 = vadd.f32 0.0036580483, %v95_v25  ;;  %v107_v30 = vadd.f32 0.014752088, %v106_v26  ;;  %v136_v33 = vadd.f32 0.0036580483, %v135_v27 }
  0xa1   :  { %v147_v31 = vadd.f32 0.014752088, %v146_v28 }
  0xa2   :  { %v108_v32 = vmul.f32 %v107_v30, %v92_v15  ;;  %v97_v35 = vmul.f32 %v96_v29, %v92_v15  ;;  %v137_v39 = vmul.f32 %v136_v33, %v132_v16 }
  0xa3   :  { %v148_v34 = vmul.f32 %v147_v31, %v132_v16 }
  0xa4   :  { %v109_v36 = vadd.f32 0.112945676, %v108_v32  ;;  %v98_v41 = vadd.f32 0.05243302, %v97_v35  ;;  %v138_v45 = vadd.f32 0.05243302, %v137_v39 }
  0xa5   :  { %v149_v37 = vadd.f32 0.112945676, %v148_v34 }
  0xa6   :  { %v110_v38 = vmul.f32 %v109_v36, %v92_v15  ;;  %v99_v47 = vmul.f32 %v98_v41, %v92_v15  ;;  %v139_v50 = vmul.f32 %v138_v45, %v132_v16 }
  0xa7   :  { %v150_v40 = vmul.f32 %v149_v37, %v132_v16 }
  0xa8   :  { %v111_v42 = vadd.f32 0.4994258, %v110_v38  ;;  %v100_v51 = vadd.f32 0.18741608, %v99_v47  ;;  %v140_v52 = vadd.f32 0.18741608, %v139_v50 }
  0xa9   :  { %v151_v43 = vadd.f32 0.4994258, %v150_v40 }
  0xaa   :  { %v112_v44 = vmul.f32 %v111_v42, %v92_v15  ;;  %v101_v54 = vmul.f32 %v100_v51, %v92_v15  ;;  %v141_v57 = vmul.f32 %v140_v52, %v132_v16 }
  0xab   :  { %v152_v46 = vmul.f32 %v151_v43, %v132_v16 }
  0xac   :  { %v113_v48 = vadd.f32 1.0, %v112_v44  ;;  %v102_v60 = vadd.f32 1.1283791, %v101_v54  ;;  %v142_v2 = vadd.f32 1.1283791, %v141_v57 }
  0xad   :  { %v153_v49 = vadd.f32 1.0, %v152_v46 }
  0xae   :  { %212 = vrcp.f32 %v113_v48  ;;  %v125_v61 = vand.u32 2147483648, %v113_v48  ;;  %v123_v0 = vand.u32 2147483647, %v113_v48  ;;  %vm119_vm3 = vweird.f32 %v113_v48 }
  0xaf   :  { %214 = vrcp.f32 %v153_v49  ;;  %v165_v1 = vand.u32 2147483648, %v153_v49  ;;  %v163_v4 = vand.u32 2147483647, %v153_v49  ;;  %vm159_vm5 = vweird.f32 %v153_v49 }
  0xb0   :  { %v126_v6 = vor.u32 1.1754944e-38, %v125_v61  ;;  %v103_v8 = vmul.f32 %v102_v60, %v339_v11  ;;  %vm124_vm6 = vcmp.eq.f32.partialorder %v123_v0, 8.507059e+37  ;;  %v143_v16 = vmul.f32 %v142_v2, %v342_v12 }
  0xb1   :  { %v166_v14 = vor.u32 1.1754944e-38, %v165_v1  ;;  %vm164_vm8 = vcmp.eq.f32.partialorder %v163_v4, 8.507059e+37  ;;  %v88_v11 = vmul.f32 0.5, %v336_v10 }
  0xb4   :  { %v213_v53 = vpop.eup %212 }
  0xb5   :  { %v215_v55 = vpop.eup %214  ;;  %v115_v56 = vmul.f32 %v213_v53, %v113_v48  ;;  %vm120_vm1 = vweird.f32 %v213_v53 }
  0xb6   :  { %v155_v58 = vmul.f32 %v215_v55, %v153_v49  ;;  %vm160_vm2 = vweird.f32 %v215_v55  ;;  %vm121_vm4 = vmor %vm119_vm3, %vm120_vm1 }
  0xb7   :  { %v116_v59 = vsub.f32 1.0, %v115_v56  ;;  %vm161_vm7 = vmor %vm159_vm5, %vm160_vm2 }
  0xb8   :  { %v156_v62 = vsub.f32 1.0, %v155_v58 }
  0xb9   :  { %v117_v63 = vmul.f32 %v213_v53, %v116_v59 }
  0xba   :  { %v157_v3 = vmul.f32 %v215_v55, %v156_v62 }
  0xbb   :  { %v118_v5 = vadd.f32 %v213_v53, %v117_v63 }
  0xbc   :  { %v158_v7 = vadd.f32 %v215_v55, %v157_v3 }
  0xbd   :  { %v122_v13 = vsel %vm121_vm4, %v213_v53, %v118_v5 }
  0xbe   :  { %v127_v15 = vsel %vm124_vm6, %v126_v6, %v122_v13  ;;  %v162_v17 = vsel %vm161_vm7, %v215_v55, %v158_v7 }
  0xbf   :  { %v128_v18 = vmul.f32 %v127_v15, %v103_v8  ;;  %v167_v19 = vsel %vm164_vm8, %v166_v14, %v162_v17 }
  0xc0   :  { %v168_v20 = vmul.f32 %v167_v19, %v143_v16 }
  0xc1   :  { %v200_v21 = vclamps-f32 %v128_v18, 1.0 }
  0xc2   :  { %v201_v22 = vclamps-f32 %v168_v20, 1.0 }
  0xc3   :  { %v171_v24 = vadd.f32 1.0, %v200_v21 }
  0xc4   :  { %v172_v25 = vadd.f32 1.0, %v201_v22 }
  0xc5   :  { %v173_v12 = vmul.f32 %v171_v24, %v87_v23 }
  0xc6   :  { %v174_v26 = vmul.f32 %v172_v25, %v88_v11 }
  0xc7   :  { %176 = vst.msk [vmem:[#allocation7] sm:$0xff] %vm175_vm9, %v173_v12 }
  0xc8   :  { %177 = vst.msk [vmem:[#allocation7 + $0x8] sm:$0xff] %vm175_vm9, %v174_v26 }
  0xc9   :  { %190 = dma.vmem_to_hbm [thread:$0]  %s183_s24, 256, %s185_s27, [#allocation4], %s295_s20, %s295_s20, %s296_s21  }
  0xca   :  { %292 = dma.done.wait [#allocation4], 256  }
  0xcb   :  { %293 = vsyncadd [#allocation4], 4294967040 }
  0xcc   :  { %195 = vsyncpa [#allocation3], 1 }
  0xcd   :  { %196 = vsyncpa [#allocation6], 1 }
  0xce   :  { %197 = vsyncpa [#allocation4], 1 }

</bundles_post_ra>
